<compile_context>
chip_gen: v7x
topology: tpu7x:2x2x1
jax: 0.10.0
libtpu: 0.0.40
codegen_flags: <defaults>
</compile_context>

<pallas_src>
import math

import jax
import jax.numpy as jnp
from jax.experimental import pallas as pl
from jax.experimental.pallas import tpu as pltpu

# Module globals from the PyTorch script.
IN_DIM = 1
N_HIDDEN_1 = 1
N_HIDDEN_2 = 1
OUT_DIM = 1

_LANES = 128                            # vreg lane width
_MAX_TILE_BYTES = 4 * 1024 * 1024       # per pipeline buffer (1-4 MiB sweet spot)
_VMEM_LIMIT_BYTES = 32 * 1024 * 1024    # scoped VMEM; safe on v5e/v6e/v7x


def _round_up(x: int, m: int) -> int:
    return ((x + m - 1) // m) * m


def _mlp_kernel(p_ref, x_ref, o_ref):
    """p_ref: (6,) f32 in SMEM = [w1, b1, w2, b2, w3, b3] (each Linear is 1x1).
    x_ref / o_ref: (row_tile, 128) tiles in VMEM, batch laid out lane-dense.
    Arithmetic is f32 on the VPU regardless of the I/O dtype."""
    w1 = p_ref[0]
    b1 = p_ref[1]
    w2 = p_ref[2]
    b2 = p_ref[3]
    w3 = p_ref[4]
    b3 = p_ref[5]

    x = x_ref[...].astype(jnp.float32)
    h = jnp.maximum(x * w1 + b1, 0.0)                 # layer1: Linear(1,1)+ReLU
    h = jnp.maximum(h * w2 + b2, 0.0)                 # layer2: Linear(1,1)+ReLU
    o_ref[...] = (h * w3 + b3).astype(o_ref.dtype)    # layer3: Linear(1,1)


def net_forward(x, params, *, row_tile=8192, donate_input=False):
    """Pallas wrapper reproducing Net.forward(x) for x of shape (B, 1).

    Only valid for the 1-wide configuration of this module; wider feature dims
    would use an MXU matmul kernel instead of this elementwise path.

    * B % 128 == 0  -> completely copy-free wrapper (reshape views only).
    * otherwise     -> only the <128-element lane remainder is padded / sliced.
    * pass bf16 `x` for bf16 I/O (compute stays f32); dtype-aware tiling.
    * donate_input=True aliases the input slab to the output (only safe if the
      caller no longer needs `x`).
    """
    w1, b1, w2, b2, w3, b3 = params
    B, in_dim = x.shape
    assert in_dim == 1 and w1.size == 1 and w2.size == 1 and w3.size == 1, (
        "elementwise kernel only valid for the 1x1 Linear configuration")

    dtype = x.dtype
    itemsize = jnp.dtype(dtype).itemsize
    sub = max(8, 32 // itemsize)        # sublane granularity: f32->8, bf16->16, int8->32

    # Pack the 6 scalar parameters into one SMEM-resident f32 vector.
    p_vec = jnp.stack([
        w1.reshape(()), b1.reshape(()),
        w2.reshape(()), b2.reshape(()),
        w3.reshape(()), b3.reshape(()),
    ]).astype(jnp.float32)

    # Lane-dense view of the batch: (rows, 128).
    rows = pl.cdiv(B, _LANES)
    padded = rows * _LANES
    xf = x.reshape(B)
    if padded != B:
        # Only the lane remainder (< 128 elements) is padded.  Callers that
        # care about large-batch throughput should use B % 128 == 0, which
        # makes the wrapper copy-free (pure reshape views, no pad / no slice).
        xf = jnp.pad(xf, (0, padded - B))
    x2 = xf.reshape(rows, _LANES)

    # Tile-row selection: scale with the batch, keep the grid multi-step when
    # the batch allows it (v7x megacore), respect the dtype min-tile and keep
    # the pipelined VMEM footprint under the scoped limit.
    if rows <= sub:
        tr = rows                                        # full-extent block (always legal)
    else:
        row_tile_r = max(sub, (row_tile // sub) * sub)
        tr = min((rows // sub) * sub, row_tile_r)        # scale with batch, tr <= rows
        if rows >= 2 * sub:                              # guarantee >= 2 grid steps
            tr = min(tr, _round_up(pl.cdiv(rows, 2), sub))
        tr_cap = max(sub, (_MAX_TILE_BYTES // (_LANES * itemsize) // sub) * sub)
        tr = min(tr, tr_cap)                             # 4 MiB per buffer max
    n_steps = pl.cdiv(rows, tr)
    grid = (n_steps,)

    # Triple-buffer the input stream once the grid is deep enough to benefit.
    x_pipeline_mode = pl.Buffered(3) if n_steps >= 3 else None

    cost = pl.CostEstimate(
        flops=8 * padded,                                # 3 mul + 3 add + 2 max / element
        transcendentals=0,
        bytes_accessed=2 * padded * itemsize + 6 * 4,
    )

    y2 = pl.pallas_call(
        _mlp_kernel,
        out_shape=jax.ShapeDtypeStruct((rows, _LANES), dtype),
        grid_spec=pltpu.PrefetchScalarGridSpec(
            num_scalar_prefetch=0,
            grid=grid,
            in_specs=[
                pl.BlockSpec(memory_space=pltpu.MemorySpace.SMEM),     # params
                pl.BlockSpec((tr, _LANES), lambda i: (i, 0),
                             pipeline_mode=x_pipeline_mode),           # x tile
            ],
            out_specs=pl.BlockSpec((tr, _LANES), lambda i: (i, 0)),
        ),
        compiler_params=pltpu.CompilerParams(
            dimension_semantics=("parallel",),
            vmem_limit_bytes=_VMEM_LIMIT_BYTES,
        ),
        cost_estimate=cost,
        # Reuse the input HBM slab for the output when the caller donates it
        # (saves a full-size output allocation; bytes moved are unchanged).
        input_output_aliases=({1: 0} if donate_input else {}),
    )(p_vec, x2)

    y = y2.reshape(padded)
    if padded != B:
        y = y[:B]
    return y.reshape(B, OUT_DIM)


def init_params(key, in_dim, n_hidden_1, n_hidden_2, out_dim, dtype=jnp.float32):
    """PyTorch nn.Linear default init: U(-1/sqrt(fan_in), 1/sqrt(fan_in)).
    Weights stored as (in_features, out_features)."""
    keys = jax.random.split(key, 6)

    def linear(kw, kb, fan_in, fan_out):
        bound = 1.0 / math.sqrt(fan_in)
        w = jax.random.uniform(kw, (fan_in, fan_out), dtype, -bound, bound)
        b = jax.random.uniform(kb, (fan_out,), dtype, -bound, bound)
        return w, b

    w1, b1 = linear(keys[0], keys[1], in_dim, n_hidden_1)
    w2, b2 = linear(keys[2], keys[3], n_hidden_1, n_hidden_2)
    w3, b3 = linear(keys[4], keys[5], n_hidden_2, out_dim)
    return (w1, b1, w2, b2, w3, b3)


def reference_forward(x, params):
    """Plain-JAX reference for sanity checking (same math as Net.forward)."""
    w1, b1, w2, b2, w3, b3 = params
    h = jnp.maximum(x @ w1 + b1, 0.0)
    h = jnp.maximum(h @ w2 + b2, 0.0)
    return h @ w3 + b3


if __name__ == "__main__":
    key = jax.random.PRNGKey(0)
    k_x, k_p = jax.random.split(key)
    params = init_params(k_p, IN_DIM, N_HIDDEN_1, N_HIDDEN_2, OUT_DIM)

    # Case 1: lane-aligned batch (B % 128 == 0) -> copy-free wrapper path.
    x_a = jax.random.normal(k_x, (1024, IN_DIM), jnp.float32)
    y_a = jax.block_until_ready(net_forward(x_a, params))
    assert y_a.shape == (1024, OUT_DIM)
    assert jnp.allclose(y_a, reference_forward(x_a, params), atol=1e-6, rtol=1e-6)

    # Case 2: ragged batch -> <128-element lane pad + tail slice, 2-step grid.
    x_b = jax.random.normal(k_x, (2000, IN_DIM), jnp.float32)
    y_b = jax.block_until_ready(net_forward(x_b, params))
    assert y_b.shape == (2000, OUT_DIM)
    assert jnp.allclose(y_b, reference_forward(x_b, params), atol=1e-6, rtol=1e-6)

    # Case 3: multi-step grid (3 steps) -> triple-buffered input + ragged last
    # row block handled by Pallas clipping; no pad (5120 % 128 == 0).
    x_c = jax.random.normal(k_x, (5120, IN_DIM), jnp.float32)
    y_c = jax.block_until_ready(net_forward(x_c, params, row_tile=16))
    assert jnp.allclose(y_c, reference_forward(x_c, params), atol=1e-6, rtol=1e-6)

    # Case 4: bf16 I/O (opt-in via input dtype); params / arithmetic stay f32.
    x_d = jax.random.normal(k_x, (2048, IN_DIM), jnp.float32).astype(jnp.bfloat16)
    y_d = jax.block_until_ready(net_forward(x_d, params))
    y_d_ref = reference_forward(x_d.astype(jnp.float32), params)
    assert y_d.dtype == jnp.bfloat16
    assert jnp.allclose(y_d.astype(jnp.float32), y_d_ref, atol=1e-2, rtol=1e-2)

    print("KERNEL_OK")
</pallas_src>

<mosaic_0001>
module attributes {stable_mosaic.version = 11 : i64} {
  func.func @_mlp_kernel(%arg0: i32, %arg1: memref<6xf32, #tpu.memory_space<smem>>, %arg2: memref<8x128xf32, #tpu.memory_space<vmem>>, %arg3: memref<8x128xf32, #tpu.memory_space<vmem>>) attributes {dimension_semantics = [#tpu.dimension_semantics<parallel>], iteration_bounds = array<i64: 1>, scalar_prefetch = 0 : i64, scratch_operands = 0 : i64, tpu.core_type = #tpu.core_type<tc>, window_params = [{transform_indices = @transform_0, window_bounds = array<i64: 6>}, {transform_indices = @transform_1, window_bounds = array<i64: 8, 128>}, {transform_indices = @transform_2, window_bounds = array<i64: 8, 128>}]} {
    %c0 = arith.constant 0 : index
    %0 = memref.load %arg1[%c0] : memref<6xf32, #tpu.memory_space<smem>>
    %c1 = arith.constant 1 : index
    %1 = memref.load %arg1[%c1] : memref<6xf32, #tpu.memory_space<smem>>
    %c2 = arith.constant 2 : index
    %2 = memref.load %arg1[%c2] : memref<6xf32, #tpu.memory_space<smem>>
    %c3 = arith.constant 3 : index
    %3 = memref.load %arg1[%c3] : memref<6xf32, #tpu.memory_space<smem>>
    %c4 = arith.constant 4 : index
    %4 = memref.load %arg1[%c4] : memref<6xf32, #tpu.memory_space<smem>>
    %c5 = arith.constant 5 : index
    %5 = memref.load %arg1[%c5] : memref<6xf32, #tpu.memory_space<smem>>
    %c0_0 = arith.constant 0 : index
    %c0_1 = arith.constant 0 : index
    %6 = vector.load %arg2[%c0_0, %c0_1] : memref<8x128xf32, #tpu.memory_space<vmem>>, vector<8x128xf32>
    %7 = vector.broadcast %0 : f32 to vector<8x128xf32>
    %8 = arith.mulf %6, %7 : vector<8x128xf32>
    %9 = vector.broadcast %1 : f32 to vector<8x128xf32>
    %10 = arith.addf %8, %9 : vector<8x128xf32>
    %cst = arith.constant 0.000000e+00 : f32
    %11 = vector.broadcast %cst : f32 to vector<8x128xf32>
    %12 = arith.maximumf %10, %11 : vector<8x128xf32>
    %13 = vector.broadcast %2 : f32 to vector<8x128xf32>
    %14 = arith.mulf %12, %13 : vector<8x128xf32>
    %15 = vector.broadcast %3 : f32 to vector<8x128xf32>
    %16 = arith.addf %14, %15 : vector<8x128xf32>
    %cst_2 = arith.constant 0.000000e+00 : f32
    %17 = vector.broadcast %cst_2 : f32 to vector<8x128xf32>
    %18 = arith.maximumf %16, %17 : vector<8x128xf32>
    %19 = vector.broadcast %4 : f32 to vector<8x128xf32>
    %20 = arith.mulf %18, %19 : vector<8x128xf32>
    %21 = vector.broadcast %5 : f32 to vector<8x128xf32>
    %22 = arith.addf %20, %21 : vector<8x128xf32>
    %c0_3 = arith.constant 0 : index
    %c0_4 = arith.constant 0 : index
    %23 = vector.load %arg3[%c0_3, %c0_4] : memref<8x128xf32, #tpu.memory_space<vmem>>, vector<8x128xf32>
    tpu.vector_store %arg3[%c0_3, %c0_4], %22 {strides = array<i32>} : memref<8x128xf32, #tpu.memory_space<vmem>>, vector<8x128xf32>,
    return
  }
  func.func @transform_0(%arg0: i32) -> i32 {
    %c0_i32 = arith.constant 0 : i32
    %c0_i32_0 = arith.constant 0 : i32
    return %c0_i32 : i32
  }
  func.func @transform_1(%arg0: i32) -> (i32, i32) {
    %c0_i32 = arith.constant 0 : i32
    %c0_i32_0 = arith.constant 0 : i32
    return %arg0, %c0_i32 : i32, i32
  }
  func.func @transform_2(%arg0: i32) -> (i32, i32) {
    %c0_i32 = arith.constant 0 : i32
    %c0_i32_0 = arith.constant 0 : i32
    return %arg0, %c0_i32 : i32, i32
  }
}

</mosaic_0001>

<bundles_post_ra>
// kernel: tpu_custom_call.1
= control target key start
LH: loop header
LB: loop body
LE: loop exit
PB: predicated region body
PF: predicated region fallthrough
CT: control target
= control target key end

     0   :  { %7 = vsyncpa [#allocation5], 0  ;;  %s195_s0 = inlined_call_operand.hbm [shape: f32[6], index: 0, kind: input, shape index: {}]   ;;  %s196_s1 = inlined_call_operand.hbm [shape: f32[8,128], index: 1, kind: input, shape index: {}]   ;;  %s197_s2 = inlined_call_operand.hbm [shape: f32[8,128], index: 2, kind: output, shape index: {}]  }
   0x1   :  { %8 = vsyncpa [#allocation3], 0 }
   0x2   :  { %9 = vsyncpa [#allocation4], 0  ;;  %s81_s11 = scalar_lea.hbm %s195_s0, 16 }
   0x3   :  { %p82_p0 = scmp.ne.s32.totalorder %s195_s0, %s81_s11  ;;  %p85_p1 = scmp.lt.u32.totalorder %s81_s11, %s195_s0 }
   0x5   :  { %p87_p2 = pnand %p85_p1, %p82_p0 }
   0x7   :  { %90 = shalt.err (!%p87_p2)
}
   0x8   :  { %s141_s16 = smov [#allocation2]   ;;  %s142_s19 = smov [#allocation6]  }
   0x9   :  { %17 = dma.hbm_to_smem %s195_s0, 16, %s141_s16, [#allocation5]  }
   0xa   :  { %s24_s20 = sshll.u32 %s142_s19, 4  ;;  %s91_s23 = scalar_lea.hbm %s196_s1, 128  ;;  %s25_s20 = int_to_ptr.vmem [resolvable:$true] %s24_s20 }
   0xb   :  { %p92_p3 = scmp.ne.s32.totalorder %s196_s1, %s91_s23  ;;  %p95_p4 = scmp.lt.u32.totalorder %s91_s23, %s196_s1 }
   0xd   :  { %p97_p5 = pnand %p95_p4, %p92_p3 }
   0xf   :  { %100 = shalt.err (!%p97_p5)
}
  0x10   :  { %s101_s28 = scalar_lea.vmem %s25_s20, 128  ;;  %p106_p7 = scmp.lt.s32.totalorder %s25_s20, %s25_s20 }
  0x11   :  { %p102_p6 = scmp.ne.s32.totalorder %s25_s20, %s101_s28  ;;  %p107_p8 = scmp.lt.s32.totalorder %s101_s28, %s101_s28 }
  0x13   :  { %p108_p9 = por %p107_p8, %p106_p7 }
  0x15   :  { %p109_p10 = pnand %p108_p9, %p102_p6 }
  0x17   :  { %112 = shalt.err (!%p109_p10)
}
  0x18   :  { %27 = dma.hbm_to_vmem [thread:$0]  %s196_s1, 128, %s25_s20, [#allocation3]  }
  0x19   :  { %135 = dma.done.wait [#allocation5], 16  }
  0x1a   :  { %136 = vsyncadd [#allocation5], 4294967280 }
  0x1b   :  { %137 = dma.done.wait [#allocation3], 128  }
  0x1c   :  { %138 = vsyncadd [#allocation3], 4294967168 }
  0x1d   :  { %34 = sfence }
  0x1e   :  { %s35_s30 = sld [smem:[#allocation2]]  ;;  %s73_s3 = sld [smem:[#allocation2 + $0x1]]  ;;  %v41_v0 = vld [vmem:[#allocation6] sm:$0xff] }
  0x1f   :  { %s74_s4 = sld [smem:[#allocation2 + $0x2]]  ;;  %s75_s5 = sld [smem:[#allocation2 + $0x3]] }
  0x20   :  { %s76_s6 = sld [smem:[#allocation2 + $0x4]]  ;;  %s77_s7 = sld [smem:[#allocation2 + $0x5]] }
  0x21   :  { %s143_s1 = smov [#allocation7]  }
  0x22   :  { %s63_s8 = sshll.u32 %s143_s1, 4  ;;  %s64_s8 = int_to_ptr.vmem [resolvable:$true] %s63_s8 }
  0x23   :  { %s113_s9 = scalar_lea.vmem %s64_s8, 128  ;;  %p118_p12 = scmp.lt.s32.totalorder %s64_s8, %s64_s8 }
  0x24   :  { %v42_v1 = vstv %s35_s30  ;;  %v44_v2 = vstv %s73_s3  ;;  %p114_p11 = scmp.ne.s32.totalorder %s64_s8, %s113_s9  ;;  %p119_p13 = scmp.lt.s32.totalorder %s113_s9, %s113_s9 }
  0x25   :  { %v43_v3 = vmul.f32 %v42_v1, %v41_v0  ;;  %v47_v5 = vstv %s74_s4  ;;  %v49_v7 = vstv %s75_s5 }
  0x26   :  { %v52_v10 = vstv %s76_s6  ;;  %v54_v12 = vstv %s77_s7  ;;  %p120_p0 = por %p119_p13, %p118_p12 }
  0x27   :  { %v45_v4 = vadd.f32 %v44_v2, %v43_v3 }
  0x28   :  { %p121_p1 = pnand %p120_p0, %p114_p11 }
  0x29   :  { %v46_v6 = vmax.f32 %v45_v4, 0.0 }
  0x2b   :  { %v48_v8 = vmul.f32 %v47_v5, %v46_v6 }
  0x2d   :  { %v50_v9 = vadd.f32 %v49_v7, %v48_v8 }
  0x2f   :  { %v51_v11 = vmax.f32 %v50_v9, 0.0 }
  0x31   :  { %v53_v13 = vmul.f32 %v52_v10, %v51_v11 }
  0x33   :  { %v55_v14 = vadd.f32 %v54_v12, %v53_v13 }
  0x35   :  { %56 = vst [vmem:[#allocation7] sm:$0xff] %v55_v14 }
  0x36   :  { %124 = shalt.err (!%p121_p1)
}
  0x37   :  { %s125_s12 = scalar_lea.hbm %s197_s2, 128 }
  0x38   :  { %p126_p2 = scmp.ne.s32.totalorder %s197_s2, %s125_s12  ;;  %p129_p3 = scmp.lt.u32.totalorder %s125_s12, %s197_s2 }
  0x3a   :  { %p131_p4 = pnand %p129_p3, %p126_p2 }
  0x3c   :  { %134 = shalt.err (!%p131_p4)
}
  0x3d   :  { %66 = dma.vmem_to_hbm [thread:$0]  %s64_s8, 128, %s197_s2, [#allocation4]  }
  0x3e   :  { %139 = dma.done.wait [#allocation4], 128  }
  0x3f   :  { %140 = vsyncadd [#allocation4], 4294967168 }
  0x40   :  { %70 = vsyncpa [#allocation3], 1 }
  0x41   :  { %71 = vsyncpa [#allocation4], 1 }
  0x42   :  { %72 = vsyncpa [#allocation5], 1 }

</bundles_post_ra>
